<compile_context>
chip_gen: v6e
topology: v6e:2x2x1
jax: 0.10.0
libtpu: 0.0.40
codegen_flags: <defaults>
</compile_context>

<pallas_src>
import jax
import jax.numpy as jnp
from jax.experimental import pallas as pl
from jax.experimental.pallas import tpu as pltpu


# ----------------------------------------------------------------------------
# Kernels
# ----------------------------------------------------------------------------

def _se_kernel(x_ref, w1_ref, w2_ref, o_ref):
    """Single-pass SE on an NCHW-native block.

    x_ref : (Bt, C, HW)  HW on the lane axis (no HBM transposes anywhere)
    w1_ref: (C, C_r)     first Linear weight, pre-transposed & pre-scaled by 1/HW
    w2_ref: (C_r, C)     second Linear weight, pre-transposed
    o_ref : (Bt, C, HW)
    """
    # squeeze: sum over the spatial (lane) axis, f32 accumulate; 1/HW is in w1.
    pooled = jnp.sum(x_ref[...].astype(jnp.float32), axis=2)                    # (Bt, C)

    # excitation: Linear -> ReLU -> Linear -> Sigmoid (tiny; MXU underfill is irrelevant)
    h = jnp.maximum(jnp.dot(pooled, w1_ref[...],
                            preferred_element_type=jnp.float32), 0.0)           # (Bt, C_r)
    y = jax.nn.sigmoid(jnp.dot(h, w2_ref[...],
                               preferred_element_type=jnp.float32))             # (Bt, C)
    gate = y.astype(o_ref.dtype)                                                 # tiny cast

    # scale: re-read x_ref (short live range across the matmuls), multiply in input dtype.
    o_ref[...] = x_ref[...] * gate[:, :, None]


def _pool_excite_kernel(x_ref, w1_ref, w2_ref, g_ref, acc_ref):
    """Phase 1 of the large-HW path: streamed pooled-sum + excitation -> gate (Bt, C, 1)."""
    hw = pl.program_id(1)

    @pl.when(hw == 0)
    def _():
        acc_ref[...] = jnp.zeros_like(acc_ref)

    acc_ref[...] += jnp.sum(x_ref[...].astype(jnp.float32), axis=2)              # (Bt, C)

    @pl.when(hw == pl.num_programs(1) - 1)
    def _():
        h = jnp.maximum(jnp.dot(acc_ref[...], w1_ref[...],
                                preferred_element_type=jnp.float32), 0.0)
        y = jax.nn.sigmoid(jnp.dot(h, w2_ref[...],
                                   preferred_element_type=jnp.float32))
        g_ref[...] = y[:, :, None].astype(g_ref.dtype)


def _scale_kernel(g_ref, x_ref, o_ref):
    """Phase 2 of the large-HW path: streaming per-(batch, channel) scale."""
    o_ref[...] = x_ref[...] * g_ref[...]


# ----------------------------------------------------------------------------
# Sizing helpers (generation-aware)
# ----------------------------------------------------------------------------

def _vmem_capacity_bytes():
    try:
        info = pltpu.get_tpu_info()
        return int(getattr(info, "vmem_capacity_bytes", 64 * 1024 * 1024))
    except Exception:
        return 64 * 1024 * 1024          # conservative (v7x: 64 MiB / TC)


def _num_tensorcores():
    try:
        d = jax.devices()[0]
        n = getattr(d, "num_cores", None)
        if n:
            return int(n)
        if "v7" in str(getattr(d, "device_kind", "")).lower():
            return 2
    except Exception:
        pass
    return 1


def _pick_bt(B, slab_bytes, io_budget, multi_core):
    """Largest divisor of B whose double-buffered in+out blocks fit io_budget.
    Returns None if even bt=1 does not fit (caller uses the HW-tiled path)."""
    divisors = [d for d in range(1, B + 1) if B % d == 0]
    fitting = [d for d in divisors if 4 * d * slab_bytes <= io_budget]
    if not fitting:
        return None
    bt = max(fitting)
    if multi_core:
        # v7x: prefer an even number of grid steps so both TensorCores get equal work.
        even = [d for d in fitting if (B // d) % 2 == 0]
        if even:
            bt = max(even)
    return bt


def _pick_hw_tile(HW, C, itemsize, io_budget):
    """Largest divisor of HW whose double-buffered in+out blocks fit io_budget;
    prefer lane-dense (multiple-of-128) tiles."""
    divisors = [d for d in range(1, HW + 1) if HW % d == 0]
    fitting = [d for d in divisors if 4 * C * d * itemsize <= io_budget] or [1]
    lane_dense = [d for d in fitting if d % 128 == 0]
    return max(lane_dense) if lane_dense else max(fitting)


def _vmem_limit(block_io_bytes, weight_bytes, vmem_cap):
    """Scoped-VMEM request derived from actual usage, with headroom."""
    need = block_io_bytes + 2 * weight_bytes + (2 << 20)
    limit = int(need * 1.25) + (4 << 20)
    limit = max(limit, 32 << 20)
    limit = min(limit, max(vmem_cap - (8 << 20), 16 << 20))
    return limit


# ----------------------------------------------------------------------------
# Wrapper
# ----------------------------------------------------------------------------

def se_layer(x, w1, w2, *, io_budget_bytes=None):
    """SE forward. x: (B, C, H, W); w1: (C//r, C); w2: (C, C//r) (PyTorch Linear)."""
    B, C, H, W = x.shape
    HW = H * W
    itemsize = jnp.dtype(x.dtype).itemsize

    vmem_cap = _vmem_capacity_bytes()
    cores = _num_tensorcores()
    if io_budget_bytes is None:
        # half of VMEM for the pipelined I/O blocks: 64 MiB on v5e/v6e, 32 MiB on v7x.
        io_budget_bytes = max(vmem_cap // 2, 16 * 1024 * 1024)

    # NCHW-native: contiguous reshape only (free); no HBM transposes.
    x3 = x.reshape(B, C, HW)

    # Weights pre-transposed once in the wrapper; 1/HW folded into w1.
    w1_t = jnp.transpose(w1).astype(jnp.float32) * (1.0 / HW)     # (C, C_r)
    w2_t = jnp.transpose(w2).astype(jnp.float32)                  # (C_r, C)
    C_r = w1_t.shape[1]
    weight_bytes = 2 * C * C_r * 4

    slab_bytes = C * HW * itemsize            # one batch element (input OR output)
    bt = _pick_bt(B, slab_bytes, io_budget_bytes, cores >= 2)

    cost = pl.CostEstimate(
        flops=4 * B * C * C_r + 2 * B * C * HW,
        transcendentals=B * C,
        bytes_accessed=2 * B * C * HW * itemsize + weight_bytes,
    )

    if bt is not None:
        # ---- single-kernel path: whole (C, HW) slabs fit the VMEM budget ----
        # TODO(synk): for HW < 128 a channels-last in-VMEM-transpose variant would
        # give lane-dense stores; masked stores here are correct, just slower.
        block_io = 4 * bt * slab_bytes
        out3 = pl.pallas_call(
            _se_kernel,
            out_shape=jax.ShapeDtypeStruct((B, C, HW), x.dtype),
            grid_spec=pltpu.PrefetchScalarGridSpec(
                num_scalar_prefetch=0,
                grid=(B // bt,),
                in_specs=[
                    pl.BlockSpec((bt, C, HW), lambda b: (b, 0, 0)),
                    pl.BlockSpec((C, C_r), lambda b: (0, 0)),
                    pl.BlockSpec((C_r, C), lambda b: (0, 0)),
                ],
                out_specs=pl.BlockSpec((bt, C, HW), lambda b: (b, 0, 0)),
            ),
            compiler_params=pltpu.CompilerParams(
                dimension_semantics=("parallel",),
                vmem_limit_bytes=_vmem_limit(block_io, weight_bytes, vmem_cap),
            ),
            cost_estimate=cost,
        )(x3, w1_t, w2_t)
        return out3.reshape(B, C, H, W)

    # ---- two-phase path: one (C, HW) slab is too large -> tile HW and stream ----
    hw_t = _pick_hw_tile(HW, C, itemsize, io_budget_bytes)
    n_hw = HW // hw_t
    block_io = 4 * C * hw_t * itemsize
    vmem_limit = _vmem_limit(block_io, weight_bytes, vmem_cap)

    gate = pl.pallas_call(
        _pool_excite_kernel,
        out_shape=jax.ShapeDtypeStruct((B, C, 1), x.dtype),
        grid_spec=pltpu.PrefetchScalarGridSpec(
            num_scalar_prefetch=0,
            grid=(B, n_hw),
            in_specs=[
                pl.BlockSpec((1, C, hw_t), lambda b, h: (b, 0, h)),
                pl.BlockSpec((C, C_r), lambda b, h: (0, 0)),
                pl.BlockSpec((C_r, C), lambda b, h: (0, 0)),
            ],
            out_specs=pl.BlockSpec((1, C, 1), lambda b, h: (b, 0, 0)),
            scratch_shapes=[pltpu.VMEM((1, C), jnp.float32)],
        ),
        compiler_params=pltpu.CompilerParams(
            dimension_semantics=("parallel", "arbitrary"),
            vmem_limit_bytes=vmem_limit,
        ),
    )(x3, w1_t, w2_t)

    out3 = pl.pallas_call(
        _scale_kernel,
        out_shape=jax.ShapeDtypeStruct((B, C, HW), x.dtype),
        grid_spec=pltpu.PrefetchScalarGridSpec(
            num_scalar_prefetch=0,
            grid=(B, n_hw),
            in_specs=[
                pl.BlockSpec((1, C, 1), lambda b, h: (b, 0, 0)),
                pl.BlockSpec((1, C, hw_t), lambda b, h: (b, 0, h)),
            ],
            out_specs=pl.BlockSpec((1, C, hw_t), lambda b, h: (b, 0, h)),
        ),
        compiler_params=pltpu.CompilerParams(
            dimension_semantics=("parallel", "parallel"),
            vmem_limit_bytes=vmem_limit,
        ),
        cost_estimate=cost,
    )(gate, x3)
    return out3.reshape(B, C, H, W)


def se_layer_ref(x, w1, w2):
    """Pure-JAX reference mirroring the PyTorch forward."""
    y = jnp.mean(x, axis=(2, 3))                    # (B, C)
    y = jnp.maximum(y @ w1.T, 0.0)                  # (B, C_r)
    y = jax.nn.sigmoid(y @ w2.T)                    # (B, C)
    return x * y[:, :, None, None]


if __name__ == "__main__":
    B, C, H, W = 2, 64, 16, 16
    reduction = 16
    C_r = C // reduction

    key = jax.random.PRNGKey(0)
    kx, k1, k2 = jax.random.split(key, 3)
    x = jax.random.normal(kx, (B, C, H, W), dtype=jnp.float32)
    # PyTorch Linear weight shape convention: (out_features, in_features).
    w1 = jax.random.normal(k1, (C_r, C), dtype=jnp.float32) * 0.1
    w2 = jax.random.normal(k2, (C, C_r), dtype=jnp.float32) * 0.1

    ref = se_layer_ref(x, w1, w2)

    # primary single-kernel path
    out = jax.block_until_ready(se_layer(x, w1, w2))
    assert out.shape == (B, C, H, W)
    assert jnp.allclose(out, ref, atol=1e-5, rtol=1e-5), "mismatch (single-kernel path)"

    # force the large-HW two-phase path with a tiny block budget to exercise it
    out2 = jax.block_until_ready(se_layer(x, w1, w2, io_budget_bytes=128 * 1024))
    assert jnp.allclose(out2, ref, atol=1e-5, rtol=1e-5), "mismatch (two-phase path)"

    print("KERNEL_OK")
</pallas_src>

<mosaic_0001>
module attributes {stable_mosaic.version = 11 : i64} {
  func.func @_se_kernel(%arg0: i32, %arg1: memref<2x64x256xf32, #tpu.memory_space<vmem>>, %arg2: memref<64x4xf32, #tpu.memory_space<vmem>>, %arg3: memref<4x64xf32, #tpu.memory_space<vmem>>, %arg4: memref<2x64x256xf32, #tpu.memory_space<vmem>>) attributes {dimension_semantics = [#tpu.dimension_semantics<parallel>], iteration_bounds = array<i64: 1>, scalar_prefetch = 0 : i64, scratch_operands = 0 : i64, tpu.core_type = #tpu.core_type<tc>, window_params = [{transform_indices = @transform_0, window_bounds = array<i64: 2, 64, 256>}, {pipeline_mode = #tpu.pipeline_mode<synchronous>, transform_indices = @transform_1, window_bounds = array<i64: 64, 4>}, {pipeline_mode = #tpu.pipeline_mode<synchronous>, transform_indices = @transform_2, window_bounds = array<i64: 4, 64>}, {transform_indices = @transform_3, window_bounds = array<i64: 2, 64, 256>}]} {
    %c0 = arith.constant 0 : index
    %c0_0 = arith.constant 0 : index
    %c0_1 = arith.constant 0 : index
    %0 = vector.load %arg1[%c0, %c0_0, %c0_1] : memref<2x64x256xf32, #tpu.memory_space<vmem>>, vector<2x64x256xf32>
    %cst = arith.constant dense<0.000000e+00> : vector<2x64xf32>
    %1 = vector.multi_reduction <add>, %0, %cst [2] : vector<2x64x256xf32> to vector<2x64xf32>
    %c0_2 = arith.constant 0 : index
    %c0_3 = arith.constant 0 : index
    %2 = vector.load %arg2[%c0_2, %c0_3] : memref<64x4xf32, #tpu.memory_space<vmem>>, vector<64x4xf32>
    %cst_4 = arith.constant dense<0.000000e+00> : vector<2x4xf32>
    %3 = tpu.matmul %1, %2, %cst_4 {dimension_numbers = #tpu.dot_dimension_numbers<[1], [0], [0], [1], [0, 0, 1, 1], [], []>} : vector<2x64xf32>, vector<64x4xf32>, vector<2x4xf32> -> vector<2x4xf32>
    %cst_5 = arith.constant 0.000000e+00 : f32
    %4 = vector.broadcast %cst_5 : f32 to vector<2x4xf32>
    %5 = arith.maximumf %3, %4 : vector<2x4xf32>
    %c0_6 = arith.constant 0 : index
    %c0_7 = arith.constant 0 : index
    %6 = vector.load %arg3[%c0_6, %c0_7] : memref<4x64xf32, #tpu.memory_space<vmem>>, vector<4x64xf32>
    %cst_8 = arith.constant dense<0.000000e+00> : vector<2x64xf32>
    %7 = tpu.matmul %5, %6, %cst_8 {dimension_numbers = #tpu.dot_dimension_numbers<[1], [0], [0], [1], [0, 0, 1, 1], [], []>} : vector<2x4xf32>, vector<4x64xf32>, vector<2x64xf32> -> vector<2x64xf32>
    %8 = arith.negf %7 : vector<2x64xf32>
    %9 = math.exp %8 : vector<2x64xf32>
    %cst_9 = arith.constant 1.000000e+00 : f32
    %10 = vector.broadcast %cst_9 : f32 to vector<2x64xf32>
    %11 = arith.addf %10, %9 : vector<2x64xf32>
    %12 = arith.divf %10, %11 : vector<2x64xf32>
    %c0_10 = arith.constant 0 : index
    %c0_11 = arith.constant 0 : index
    %c0_12 = arith.constant 0 : index
    %13 = vector.load %arg1[%c0_10, %c0_11, %c0_12] : memref<2x64x256xf32, #tpu.memory_space<vmem>>, vector<2x64x256xf32>
    %14 = vector.shape_cast %12 : vector<2x64xf32> to vector<2x64x1xf32>
    %15 = vector.broadcast %14 : vector<2x64x1xf32> to vector<2x64x256xf32>
    %16 = arith.mulf %13, %15 : vector<2x64x256xf32>
    %c0_13 = arith.constant 0 : index
    %c0_14 = arith.constant 0 : index
    %c0_15 = arith.constant 0 : index
    %17 = vector.load %arg4[%c0_13, %c0_14, %c0_15] : memref<2x64x256xf32, #tpu.memory_space<vmem>>, vector<2x64x256xf32>
    tpu.vector_store %arg4[%c0_13, %c0_14, %c0_15], %16 {strides = array<i32>} : memref<2x64x256xf32, #tpu.memory_space<vmem>>, vector<2x64x256xf32>,
    return
  }
  func.func @transform_0(%arg0: i32) -> (i32, i32, i32) {
    %c0_i32 = arith.constant 0 : i32
    %c0_i32_0 = arith.constant 0 : i32
    %c0_i32_1 = arith.constant 0 : i32
    return %arg0, %c0_i32, %c0_i32_0 : i32, i32, i32
  }
  func.func @transform_1(%arg0: i32) -> (i32, i32) {
    %c0_i32 = arith.constant 0 : i32
    %c0_i32_0 = arith.constant 0 : i32
    %c0_i32_1 = arith.constant 0 : i32
    return %c0_i32, %c0_i32_0 : i32, i32
  }
  func.func @transform_2(%arg0: i32) -> (i32, i32) {
    %c0_i32 = arith.constant 0 : i32
    %c0_i32_0 = arith.constant 0 : i32
    %c0_i32_1 = arith.constant 0 : i32
    return %c0_i32, %c0_i32_0 : i32, i32
  }
  func.func @transform_3(%arg0: i32) -> (i32, i32, i32) {
    %c0_i32 = arith.constant 0 : i32
    %c0_i32_0 = arith.constant 0 : i32
    %c0_i32_1 = arith.constant 0 : i32
    return %arg0, %c0_i32, %c0_i32_0 : i32, i32, i32
  }
}

</mosaic_0001>

<bundles_post_ra>
// kernel: tpu_custom_call.1
= control target key start
LH: loop header
LB: loop body
LE: loop exit
PB: predicated region body
PF: predicated region fallthrough
CT: control target
= control target key end

     0   :  { %8 = vsyncpa [#allocation3], 0  ;;  %s847_s0 = inlined_call_operand.hbm [shape: f32[2,64,256], index: 0, kind: input, shape index: {}]   ;;  %s848_s1 = inlined_call_operand.vmem [shape: f32[64,4], index: 1, kind: input, shape index: {}]   ;;  %s849_s2 = inlined_call_operand.vmem [shape: f32[4,64], index: 2, kind: input, shape index: {}]   ;;  %s850_s3 = inlined_call_operand.hbm [shape: f32[2,64,256], index: 3, kind: output, shape index: {}]  }
   0x1   :  { %9 = vsyncpa [#allocation4], 0  ;;  %s632_s12 = smov [#allocation2]  }
   0x2   :  { %s15_s13 = sshll.u32 %s632_s12, 4  ;;  %s16_s13 = int_to_ptr.vmem [resolvable:$true] %s15_s13 }
   0x3   :  { %s596_s14 = scalar_lea.vmem %s16_s13, 4096  ;;  %p601_p1 = scmp.lt.s32.totalorder %s16_s13, %s16_s13 }
   0x4   :  { %p597_p0 = scmp.ne.s32.totalorder %s16_s13, %s596_s14  ;;  %p602_p2 = scmp.lt.s32.totalorder %s596_s14, %s596_s14 }
   0x6   :  { %p603_p3 = por %p602_p2, %p601_p1 }
   0x8   :  { %p604_p4 = pnand %p603_p3, %p597_p0 }
   0xa   :  { %607 = shalt.err (!%p604_p4)
}
   0xb   :  { %s633_s15 = smov 256   ;;  %s634_s16 = smov 16  }
   0xc   :  { %21 = dma.hbm_to_vmem [thread:$0]  %s847_s0, 4096, %s16_s13, [#allocation3], %s633_s15, %s633_s15, %s634_s16  }
   0xd   :  { %628 = dma.done.wait [#allocation3], 4096  }
   0xe   :  { %629 = vsyncadd [#allocation3], 4294963200  ;;  %v664_v0 = vld [vmem:[#allocation2 + $0x80] sm:$0xff]  ;;  %v666_v1 = vld [vmem:[#allocation2 + $0x88] sm:$0xff]  ;;  %v635_v48 = vmov 0.0   ;;  %vm636_vm0 = vmmov 0   ;;  %v133_v61 = vlaneseq }
   0xf   :  { %v668_v2 = vld [vmem:[#allocation2] sm:$0xff]  ;;  %v85_v3 = vadd.f32 %v666_v1, %v664_v0  ;;  %v672_v4 = vld [vmem:[#allocation2 + $0x8] sm:$0xff]  ;;  %v674_v5 = vld [vmem:[#allocation2 + $0x90] sm:$0xff]  ;;  %554 = vmatprep.subr.mxu0 %v635_v48  ;;  %573 = vmatprep.subr.mxu1 %v635_v48  ;;  %vm144_vm1 = vcmask 130112   ;;  %vm151_vm2 = vcmask 195712   ;;  %vm158_vm3 = vcmask 261312  }
  0x10   :  { %v676_v6 = vld [vmem:[#allocation2 + $0x98] sm:$0xff]  ;;  %v61_v7 = vadd.f32 %v672_v4, %v668_v2  ;;  %v680_v8 = vld [vmem:[#allocation2 + $0x10] sm:$0xff]  ;;  %v688_v12 = vld [vmem:[#allocation2 + $0xa0] sm:$0xff]  ;;  %570 = vmatprep.mubr.msk.f32.mxu0 %vm636_vm0, %v635_v48  ;;  %575 = vmatprep.mubr.msk.f32.mxu1 %vm636_vm0, %v635_v48  ;;  %vm165_vm4 = vcmask 326912   ;;  %vm172_vm5 = vcmask 392512   ;;  %vm179_vm6 = vcmask 458112  }
  0x11   :  { %v682_v9 = vld [vmem:[#allocation2 + $0x18] sm:$0xff]  ;;  %86 = vadd.xlane.f32.xlu1 %v85_v3  ;;  %v88_v10 = vadd.f32 %v676_v6, %v674_v5  ;;  %v690_v13 = vld [vmem:[#allocation2 + $0xa8] sm:$0xff]  ;;  %v692_v14 = vld [vmem:[#allocation2 + $0x20] sm:$0xff]  ;;  %v134_v3 = vand.u32 127, %v133_v61  ;;  %vm186_vm7 = vcmask 523712   ;;  %vm227_vm8 = vcmask 1041409  }
  0x12   :  { %62 = vadd.xlane.f32.xlu0 %v61_v7  ;;  %v64_v11 = vadd.f32 %v682_v9, %v680_v8  ;;  %v694_v15 = vld [vmem:[#allocation2 + $0x28] sm:$0xff]  ;;  %v91_v16 = vadd.f32 %v690_v13, %v688_v12  ;;  %v700_v18 = vld [vmem:[#allocation2 + $0xb0] sm:$0xff]  ;;  %v702_v19 = vld [vmem:[#allocation2 + $0xb8] sm:$0xff]  ;;  %vm229_vm9 = vcmask 523264   ;;  %vm308_vm10 = vcmask 1043456  }
  0x13   :  { %v67_v17 = vadd.f32 %v694_v15, %v692_v14  ;;  %v704_v20 = vld [vmem:[#allocation2 + $0x30] sm:$0xff]  ;;  %v706_v21 = vld [vmem:[#allocation2 + $0x38] sm:$0xff]  ;;  %v94_v22 = vadd.f32 %v702_v19, %v700_v18  ;;  %v712_v24 = vld [vmem:[#allocation2 + $0xc0] sm:$0xff]  ;;  %vm304_vm11 = vcmask 31744  }
  0x14   :  { %v70_v23 = vadd.f32 %v706_v21, %v704_v20  ;;  %v714_v25 = vld [vmem:[#allocation2 + $0xc8] sm:$0xff]  ;;  %v716_v26 = vld [vmem:[#allocation2 + $0x40] sm:$0xff]  ;;  %v724_v30 = vld [vmem:[#allocation2 + $0xd0] sm:$0xff] }
  0x15   :  { %89 = vadd.xlane.f32.xlu1 %v88_v10  ;;  %v718_v27 = vld [vmem:[#allocation2 + $0x48] sm:$0xff]  ;;  %v97_v28 = vadd.f32 %v714_v25, %v712_v24  ;;  %855 = vst [vmem:[#allocation8_spill] sm:$0xff] %v724_v30  ;;  %v726_v31 = vld [vmem:[#allocation2 + $0xd8] sm:$0xff]  ;;  %v728_v32 = vld [vmem:[#allocation2 + $0x50] sm:$0xff]  ;;  %v139_v10 = vadd.s32 4294967288, %v134_v3 }
  0x16   :  { %65 = vadd.xlane.f32.xlu0 %v64_v11  ;;  %v73_v29 = vadd.f32 %v718_v27, %v716_v26  ;;  %856 = vst [vmem:[#allocation9_spill] sm:$0xff] %v726_v31  ;;  %v730_v33 = vld [vmem:[#allocation2 + $0x58] sm:$0xff]  ;;  %v100_v34 = vadd.f32 %v726_v31, %v724_v30  ;;  %v736_v36 = vld [vmem:[#allocation2 + $0xe0] sm:$0xff]  ;;  %v738_v37 = vld [vmem:[#allocation2 + $0xe8] sm:$0xff] }
  0x17   :  { %v76_v35 = vadd.f32 %v730_v33, %v728_v32  ;;  %v740_v38 = vld [vmem:[#allocation2 + $0x60] sm:$0xff]  ;;  %v742_v39 = vld [vmem:[#allocation2 + $0x68] sm:$0xff]  ;;  %v103_v40 = vadd.f32 %v738_v37, %v736_v36  ;;  %v748_v42 = vld [vmem:[#allocation2 + $0xf0] sm:$0xff] }
  0x18   :  { %v79_v41 = vadd.f32 %v742_v39, %v740_v38  ;;  %857 = vst [vmem:[#allocation10_spill] sm:$0xff] %v748_v42  ;;  %v750_v43 = vld [vmem:[#allocation2 + $0xf8] sm:$0xff]  ;;  %v752_v44 = vld [vmem:[#allocation2 + $0x70] sm:$0xff]  ;;  %v114_v51 = vld [vmem:[%s848_s1 + $0x28] sm:$0xff] }
  0x19   :  { %92 = vadd.xlane.f32.xlu1 %v91_v16  ;;  %858 = vst [vmem:[#allocation11_spill] sm:$0xff] %v750_v43  ;;  %v754_v45 = vld [vmem:[#allocation2 + $0x78] sm:$0xff]  ;;  %v106_v46 = vadd.f32 %v750_v43, %v748_v42  ;;  %v115_v50 = vld [vmem:[%s848_s1 + $0x30] sm:$0xff]  ;;  %v113_v52 = vld [vmem:[%s848_s1 + $0x20] sm:$0xff]  ;;  %v146_v16 = vadd.s32 4294967280, %v134_v3 }
  0x1a   :  { %68 = vadd.xlane.f32.xlu0 %v67_v17  ;;  %v82_v47 = vadd.f32 %v754_v45, %v752_v44  ;;  %v116_v49 = vld [vmem:[%s848_s1 + $0x38] sm:$0xff]  ;;  %v111_v54 = vld [vmem:[%s848_s1 + $0x10] sm:$0xff]  ;;  %v110_v55 = vld [vmem:[%s848_s1 + $0x8] sm:$0xff]  ;;  %v784_v17 = vshrl.u32 %v133_v61, 7 }
  0x1b   :  { %555 = vmatpush3.msra.mxu0 %v116_v49  ;;  %v112_v53 = vld [vmem:[%s848_s1 + $0x18] sm:$0xff]  ;;  %v109_v56 = vld [vmem:[%s848_s1] sm:$0xff] }
  0x1c   :  { %556 = vmatprep.subr.mxu0 %v635_v48 }
  0x1d   :  { %95 = vadd.xlane.f32.xlu1 %v94_v22  ;;  %557 = vmatpush3.msra.mxu0 %v115_v50  ;;  %v153_v22 = vadd.s32 4294967272, %v134_v3 }
  0x1e   :  { %71 = vadd.xlane.f32.xlu0 %v70_v23  ;;  %558 = vmatprep.subr.mxu0 %v635_v48  ;;  %v160_v23 = vadd.s32 4294967264, %v134_v3 }
  0x1f   :  { %559 = vmatpush3.msra.mxu0 %v114_v51 }
  0x20   :  { %560 = vmatprep.subr.mxu0 %v635_v48 }
  0x21   :  { %98 = vadd.xlane.f32.xlu1 %v97_v28  ;;  %561 = vmatpush3.msra.mxu0 %v113_v52 }
  0x22   :  { %74 = vadd.xlane.f32.xlu0 %v73_v29  ;;  %562 = vmatprep.subr.mxu0 %v635_v48  ;;  %v142_v29 = vsub.s32 %v139_v10, %v784_v17 }
  0x23   :  { %563 = vmatpush3.msra.mxu0 %v112_v53  ;;  %v181_v53 = vadd.s32 4294967240, %v134_v3 }
  0x24   :  { %564 = vmatprep.subr.mxu0 %v635_v48 }
  0x25   :  { %101 = vadd.xlane.f32.xlu1 %v100_v34  ;;  %565 = vmatpush3.msra.mxu0 %v111_v54 }
  0x26   :  { %77 = vadd.xlane.f32.xlu0 %v76_v35  ;;  %566 = vmatprep.subr.mxu0 %v635_v48  ;;  %v167_v35 = vadd.s32 4294967256, %v134_v3 }
  0x27   :  { %567 = vmatpush3.msra.mxu0 %v110_v55 }
  0x28   :  { %568 = vmatprep.subr.mxu0 %v635_v48  ;;  %v163_v48 = vsub.s32 %v160_v23, %v784_v17  ;;  %v170_v51 = vsub.s32 %v167_v35, %v784_v17 }
  0x29   :  { %104 = vadd.xlane.f32.xlu1 %v103_v40  ;;  %569 = vmatpush3.msra.mxu0 %v109_v56  ;;  %v149_v40 = vsub.s32 %v146_v16, %v784_v17 }
  0x2a   :  { %80 = vadd.xlane.f32.xlu0 %v79_v41  ;;  %v174_v41 = vadd.s32 4294967248, %v134_v3 }
  0x2c   :  { %v177_v56 = vsub.s32 %v174_v41, %v784_v17 }
  0x2d   :  { %107 = vadd.xlane.f32.xlu1 %v106_v46  ;;  %v137_v46 = vsub.s32 %v134_v3, %v784_v17 }
  0x2e   :  { %83 = vadd.xlane.f32.xlu0 %v82_v47  ;;  %v156_v47 = vsub.s32 %v153_v22, %v784_v17 }
  0x9a   :  { %v87_v57 = vpop.xlane.xlu1 %86 }
  0x9b   :  { %v63_v58 = vpop.xlane.xlu0 %62  ;;  %v191_v61 = vrot.slane %v87_v57, %v137_v46 }
  0x9c   :  { %v138_v22 = vrot.slane %v63_v58, %v137_v46 }
  0x9e   :  { %v90_v59 = vpop.xlane.xlu1 %89 }
  0x9f   :  { %v66_v60 = vpop.xlane.xlu0 %65  ;;  %v195_v50 = vrot.slane %v90_v59, %v142_v29 }
  0xa0   :  { %v143_v54 = vrot.slane %v66_v60, %v142_v29  ;;  %v184_v60 = vsub.s32 %v181_v53, %v784_v17 }
  0xa1   :  { %v196_v59 = vsel %vm144_vm1, %v195_v50, %v191_v61 }
  0xa2   :  { %v93_v62 = vpop.xlane.xlu1 %92 }
  0xa3   :  { %v69_v63 = vpop.xlane.xlu0 %68  ;;  %v200_v55 = vrot.slane %v93_v62, %v149_v40  ;;  %v145_v62 = vsel %vm144_vm1, %v143_v54, %v138_v22  ;;  %v390_v22 = vsub.s32 0, %v784_v17 }
  0xa4   :  { %v150_v10 = vrot.slane %v69_v63, %v149_v40 }
  0xa5   :  { %v201_v3 = vsel %vm151_vm2, %v200_v55, %v196_v59 }
  0xa6   :  { %v96_v7 = vpop.xlane.xlu1 %95 }
  0xa7   :  { %v72_v11 = vpop.xlane.xlu0 %71  ;;  %v205_v16 = vrot.slane %v96_v7, %v156_v47  ;;  %v152_v7 = vsel %vm151_vm2, %v150_v10, %v145_v62 }
  0xa8   :  { %v157_v43 = vrot.slane %v72_v11, %v156_v47 }
  0xa9   :  { %v206_v58 = vsel %vm158_vm3, %v205_v16, %v201_v3 }
  0xaa   :  { %v99_v28 = vpop.xlane.xlu1 %98 }
  0xab   :  { %v75_v34 = vpop.xlane.xlu0 %74  ;;  %v210_v42 = vrot.slane %v99_v28, %v163_v48  ;;  %v159_v28 = vsel %vm158_vm3, %v157_v43, %v152_v7 }
  0xac   :  { %v164_v31 = vrot.slane %v75_v34, %v163_v48 }
  0xad   :  { %v211_v29 = vsel %vm165_vm4, %v210_v42, %v206_v58  ;;  %v303_v42 = vld [vmem:[%s849_s2] sm:$0xf]  ;;  %s637_s2 = smov [#allocation5]  }
  0xae   :  { %v102_v49 = vpop.xlane.xlu1 %101  ;;  %v166_v40 = vsel %vm165_vm4, %v164_v31, %v159_v28  ;;  %574 = vmatpush3.msk.msra.mxu1 %vm308_vm10, %v303_v42  ;;  %s527_s8 = sshll.u32 %s637_s2, 4  ;;  %s528_s8 = int_to_ptr.vmem [resolvable:$true] %s527_s8 }
  0xaf   :  { %v78_v52 = vpop.xlane.xlu0 %77  ;;  %v215_v35 = vrot.slane %v102_v49, %v170_v51  ;;  %s608_s9 = scalar_lea.vmem %s528_s8, 4096  ;;  %p613_p6 = scmp.lt.s32.totalorder %s528_s8, %s528_s8 }
  0xb0   :  { %v171_v57 = vrot.slane %v78_v52, %v170_v51  ;;  %p609_p5 = scmp.ne.s32.totalorder %s528_s8, %s608_s9  ;;  %p614_p7 = scmp.lt.s32.totalorder %s608_s9, %s608_s9 }
  0xb1   :  { %v216_v41 = vsel %vm172_vm5, %v215_v35, %v211_v29  ;;  %v425_v35 = vsub.s32 1, %v784_v17 }
  0xb2   :  { %v105_v23 = vpop.xlane.xlu1 %104  ;;  %v173_v48 = vsel %vm172_vm5, %v171_v57, %v166_v40  ;;  %p615_p8 = por %p614_p7, %p613_p6 }
  0xb3   :  { %v81_v30 = vpop.xlane.xlu0 %80  ;;  %v220_v63 = vrot.slane %v105_v23, %v177_v56 }
  0xb4   :  { %v178_v11 = vrot.slane %v81_v30, %v177_v56  ;;  %p616_p9 = pnand %p615_p8, %p609_p5 }
  0xb5   :  { %v221_v49 = vsel %vm179_vm6, %v220_v63, %v216_v41 }
  0xb6   :  { %v108_v34 = vpop.xlane.xlu1 %107  ;;  %v180_v51 = vsel %vm179_vm6, %v178_v11, %v173_v48 }
  0xb7   :  { %v225_v46 = vrot.slane %v108_v34, %v184_v60  ;;  %v84_v47 = vpop.xlane.xlu0 %83 }
  0xb8   :  { %v185_v50 = vrot.slane %v84_v47, %v184_v60 }
  0xb9   :  { %v226_v52 = vsel %vm186_vm7, %v225_v46, %v221_v49 }
  0xba   :  { %v187_v30 = vsel %vm186_vm7, %v185_v50, %v180_v51 }
  0xbb   :  { %v228_v43 = vsel %vm227_vm8, %v226_v52, %v187_v30 }
  0xbc   :  { %571 = vmatmul.mubr.msk.f32.vlgmr.msra.gmra.mxu0 %vm229_vm9, %v228_v43  ;;  %v860_v43 = vld [vmem:[#allocation9_spill] sm:$0xff] }
 0x17c   :  { %v298_v31 = vpop.f32.mrf.mxu0 }
 0x17d   :  { %v302_v53 = vmax.f32 %v298_v31, 0.0  ;;  %v861_v31 = vld [vmem:[#allocation10_spill] sm:$0xff] }
 0x17e   :  { %v572_v54 = vpop.f32.mrf.mxu0 }
 0x17f   :  { %576 = vmatmul.mubr.msk.f32.vlgmr.msra.gmra.mxu1 %vm304_vm11, %v302_v53  ;;  %v862_v53 = vld [vmem:[#allocation11_spill] sm:$0xff] }
 0x23f   :  { %v378_v55 = vpop.f32.mrf.mxu1 }
 0x240   :  { %v542_v56 = vmul.f32 -1.442695, %v378_v55 }
 0x241   :  { %v577_v61 = vpop.f32.mrf.mxu1 }
 0x242   :  { %584 = vpow2.f32 %v542_v56 }
 0x24f   :  { %v585_v10 = vpop.eup %584 }
 0x250   :  { %v385_v16 = vadd.f32 1.0, %v585_v10 }
 0x252   :  { %586 = vrcp.f32 %v385_v16 }
 0x25f   :  { %v587_v23 = vpop.eup %586 }
 0x260   :  { %v391_v59 = vrot.slane %v587_v23, %v390_v22  ;;  %v426_v60 = vrot.slane %v587_v23, %v425_v35 }
 0x262   :  { %397 = vbcast.lane.b32.xlu1 %v391_v59, 264  ;;  %393 = vbcast.lane.b32.xlu0 %v391_v59, 256 }
 0x266   :  { %401 = vbcast.lane.b32.xlu1 %v391_v59, 272  ;;  %409 = vbcast.lane.b32.xlu0 %v391_v59, 288 }
 0x26a   :  { %405 = vbcast.lane.b32.xlu1 %v391_v59, 280  ;;  %417 = vbcast.lane.b32.xlu0 %v391_v59, 304 }
 0x26e   :  { %413 = vbcast.lane.b32.xlu1 %v391_v59, 296  ;;  %428 = vbcast.lane.b32.xlu0 %v426_v60, 256 }
 0x272   :  { %421 = vbcast.lane.b32.xlu1 %v391_v59, 312  ;;  %436 = vbcast.lane.b32.xlu0 %v426_v60, 272 }
 0x276   :  { %432 = vbcast.lane.b32.xlu1 %v426_v60, 264  ;;  %444 = vbcast.lane.b32.xlu0 %v426_v60, 288 }
 0x27a   :  { %440 = vbcast.lane.b32.xlu1 %v426_v60, 280  ;;  %452 = vbcast.lane.b32.xlu0 %v426_v60, 304 }
 0x27e   :  { %448 = vbcast.lane.b32.xlu1 %v426_v60, 296 }
 0x282   :  { %456 = vbcast.lane.b32.xlu1 %v426_v60, 312 }
 0x2d4   :  { %v398_v62 = vpop.permute.xlu1 %397  ;;  %v394_v3 = vpop.permute.xlu0 %393 }
 0x2d5   :  { %v460_v57 = vmul.f32 %v398_v62, %v680_v8  ;;  %v461_v63 = vmul.f32 %v398_v62, %v682_v9  ;;  %v458_v17 = vmul.f32 %v394_v3, %v668_v2  ;;  %v459_v7 = vmul.f32 %v394_v3, %v672_v4 }
 0x2d7   :  { %492 = vst [vmem:[#allocation5 + $0x10] sm:$0xff] %v460_v57  ;;  %493 = vst [vmem:[#allocation5 + $0x18] sm:$0xff] %v461_v63 }
 0x2d8   :  { %490 = vst [vmem:[#allocation5] sm:$0xff] %v458_v17  ;;  %491 = vst [vmem:[#allocation5 + $0x8] sm:$0xff] %v459_v7  ;;  %v402_v58 = vpop.permute.xlu1 %401  ;;  %v410_v11 = vpop.permute.xlu0 %409 }
 0x2d9   :  { %v462_v28 = vmul.f32 %v402_v58, %v692_v14  ;;  %v463_v29 = vmul.f32 %v402_v58, %v694_v15  ;;  %v466_v34 = vmul.f32 %v410_v11, %v716_v26  ;;  %v467_v8 = vmul.f32 %v410_v11, %v718_v27 }
 0x2db   :  { %494 = vst [vmem:[#allocation5 + $0x20] sm:$0xff] %v462_v28  ;;  %495 = vst [vmem:[#allocation5 + $0x28] sm:$0xff] %v463_v29 }
 0x2dc   :  { %498 = vst [vmem:[#allocation5 + $0x40] sm:$0xff] %v466_v34  ;;  %499 = vst [vmem:[#allocation5 + $0x48] sm:$0xff] %v467_v8  ;;  %v406_v2 = vpop.permute.xlu1 %405  ;;  %v418_v4 = vpop.permute.xlu0 %417 }
 0x2dd   :  { %v464_v9 = vmul.f32 %v406_v2, %v704_v20  ;;  %v465_v40 = vmul.f32 %v406_v2, %v706_v21  ;;  %v470_v41 = vmul.f32 %v418_v4, %v740_v38  ;;  %v471_v14 = vmul.f32 %v418_v4, %v742_v39 }
 0x2df   :  { %496 = vst [vmem:[#allocation5 + $0x30] sm:$0xff] %v464_v9  ;;  %497 = vst [vmem:[#allocation5 + $0x38] sm:$0xff] %v465_v40 }
 0x2e0   :  { %502 = vst [vmem:[#allocation5 + $0x60] sm:$0xff] %v470_v41  ;;  %503 = vst [vmem:[#allocation5 + $0x68] sm:$0xff] %v471_v14  ;;  %v414_v15 = vpop.permute.xlu1 %413  ;;  %v429_v26 = vpop.permute.xlu0 %428 }
 0x2e1   :  { %v468_v27 = vmul.f32 %v414_v15, %v728_v32  ;;  %v469_v46 = vmul.f32 %v414_v15, %v730_v33  ;;  %v474_v47 = vmul.f32 %v429_v26, %v664_v0  ;;  %v475_v20 = vmul.f32 %v429_v26, %v666_v1 }
 0x2e3   :  { %500 = vst [vmem:[#allocation5 + $0x50] sm:$0xff] %v468_v27  ;;  %501 = vst [vmem:[#allocation5 + $0x58] sm:$0xff] %v469_v46 }
 0x2e4   :  { %506 = vst [vmem:[#allocation5 + $0x80] sm:$0xff] %v474_v47  ;;  %507 = vst [vmem:[#allocation5 + $0x88] sm:$0xff] %v475_v20  ;;  %v422_v21 = vpop.permute.xlu1 %421  ;;  %v437_v38 = vpop.permute.xlu0 %436 }
 0x2e5   :  { %v472_v39 = vmul.f32 %v422_v21, %v752_v44  ;;  %v473_v48 = vmul.f32 %v422_v21, %v754_v45  ;;  %v478_v49 = vmul.f32 %v437_v38, %v688_v12  ;;  %v479_v32 = vmul.f32 %v437_v38, %v690_v13 }
 0x2e7   :  { %504 = vst [vmem:[#allocation5 + $0x70] sm:$0xff] %v472_v39  ;;  %505 = vst [vmem:[#allocation5 + $0x78] sm:$0xff] %v473_v48 }
 0x2e8   :  { %510 = vst [vmem:[#allocation5 + $0xa0] sm:$0xff] %v478_v49  ;;  %511 = vst [vmem:[#allocation5 + $0xa8] sm:$0xff] %v479_v32  ;;  %v433_v0 = vpop.permute.xlu1 %432  ;;  %v445_v1 = vpop.permute.xlu0 %444 }
 0x2e9   :  { %v476_v33 = vmul.f32 %v433_v0, %v674_v5  ;;  %v477_v50 = vmul.f32 %v433_v0, %v676_v6  ;;  %v482_v51 = vmul.f32 %v445_v1, %v712_v24  ;;  %v483_v44 = vmul.f32 %v445_v1, %v714_v25  ;;  %v859_v24 = vld [vmem:[#allocation8_spill] sm:$0xff] }
 0x2eb   :  { %508 = vst [vmem:[#allocation5 + $0x90] sm:$0xff] %v476_v33  ;;  %509 = vst [vmem:[#allocation5 + $0x98] sm:$0xff] %v477_v50 }
 0x2ec   :  { %514 = vst [vmem:[#allocation5 + $0xc0] sm:$0xff] %v482_v51  ;;  %515 = vst [vmem:[#allocation5 + $0xc8] sm:$0xff] %v483_v44  ;;  %v441_v12 = vpop.permute.xlu1 %440  ;;  %v453_v13 = vpop.permute.xlu0 %452 }
 0x2ed   :  { %v480_v45 = vmul.f32 %v441_v12, %v700_v18  ;;  %v481_v52 = vmul.f32 %v441_v12, %v702_v19  ;;  %v486_v30 = vmul.f32 %v453_v13, %v736_v36  ;;  %v487_v5 = vmul.f32 %v453_v13, %v738_v37 }
 0x2ef   :  { %512 = vst [vmem:[#allocation5 + $0xb0] sm:$0xff] %v480_v45  ;;  %513 = vst [vmem:[#allocation5 + $0xb8] sm:$0xff] %v481_v52 }
 0x2f0   :  { %518 = vst [vmem:[#allocation5 + $0xe0] sm:$0xff] %v486_v30  ;;  %519 = vst [vmem:[#allocation5 + $0xe8] sm:$0xff] %v487_v5  ;;  %v449_v6 = vpop.permute.xlu1 %448 }
 0x2f1   :  { %v484_v25 = vmul.f32 %v449_v6, %v859_v24  ;;  %v485_v42 = vmul.f32 %v449_v6, %v860_v43 }
 0x2f3   :  { %516 = vst [vmem:[#allocation5 + $0xd0] sm:$0xff] %v484_v25  ;;  %517 = vst [vmem:[#allocation5 + $0xd8] sm:$0xff] %v485_v42 }
 0x2f4   :  { %v457_v18 = vpop.permute.xlu1 %456 }
 0x2f5   :  { %v488_v19 = vmul.f32 %v457_v18, %v861_v31  ;;  %v489_v36 = vmul.f32 %v457_v18, %v862_v53 }
 0x2f7   :  { %520 = vst [vmem:[#allocation5 + $0xf0] sm:$0xff] %v488_v19  ;;  %521 = vst [vmem:[#allocation5 + $0xf8] sm:$0xff] %v489_v36 }
 0x2f8   :  { %619 = shalt.err (!%p616_p9)
}
 0x2f9   :  { %533 = dma.vmem_to_hbm [thread:$0]  %s528_s8, 4096, %s850_s3, [#allocation4], %s633_s15, %s633_s15, %s634_s16  }
 0x2fa   :  { %630 = dma.done.wait [#allocation4], 4096  }
 0x2fb   :  { %631 = vsyncadd [#allocation4], 4294963200 }
 0x2fc   :  { %537 = vsyncpa [#allocation3], 1 }
 0x2fd   :  { %538 = vsyncpa [#allocation4], 1 }

</bundles_post_ra>
